<compile_context>
chip_gen: v7x
topology: tpu7x:2x2x1
jax: 0.10.0
libtpu: 0.0.40
codegen_flags: <defaults>
</compile_context>

<pallas_src>
import functools

import jax
import jax.numpy as jnp
from jax import lax
from jax.experimental import pallas as pl
from jax.experimental.pallas import tpu as pltpu


def _tcm_kernel(ids_ref, scores_ref, bias_ref, out_ref, *,
                seq_len, b_tile, vocab_size):
    """One grid step handles `b_tile` batch rows.

    ids_ref    : (B_pad * S,)        int32, SMEM (scalar-prefetched, flattened ids)
    scores_ref : (V,)                f32,   SMEM (emb_table @ W.T, precomputed)
    bias_ref   : (1,)                f32,   SMEM (Linear bias)
    out_ref    : (1, 1, b_tile)      f32,   VMEM output block (batch on lane axis)
    """
    i = pl.program_id(0)
    inv_s = jnp.float32(1.0 / seq_len)          # hoisted
    bias = bias_ref[0]                           # hoisted scalar SMEM read
    lane = lax.broadcasted_iota(jnp.int32, (1, 1, b_tile), 2)
    row_vals = jnp.zeros((1, 1, b_tile), jnp.float32)

    for b_local in range(b_tile):                # static unroll over the batch tile
        base = (i * b_tile + b_local) * seq_len

        def token_body(s, acc):
            tok = ids_ref[base + s]              # scalar id from SMEM
            tok = jnp.minimum(jnp.maximum(tok, 0), vocab_size - 1)  # bounds guard
            return acc + scores_ref[tok]         # scalar gather of folded score

        acc = lax.fori_loop(0, seq_len, token_body, jnp.float32(0.0), unroll=True)
        val = acc * inv_s + bias                 # mean over seq + Linear bias
        row_vals = jnp.where(lane == b_local, val, row_vals)

    out_ref[...] = row_vals                      # one lane-dense store per grid step


def text_classification_forward(text, emb_table, lin_w, lin_b, *, num_tiles=1):
    """text: (B, S) int token ids -> (B, 1) logits, matching the PyTorch forward.

    num_tiles: number of grid steps the batch is split into (use 2 on v7x so both
    TensorCores get work; 1 is optimal on v5e/v6e).
    """
    B, S = text.shape
    V, D = emb_table.shape

    num_tiles = max(1, min(int(num_tiles), B))
    b_tile = pl.cdiv(B, num_tiles)
    B_pad = num_tiles * b_tile

    # Wrapper-side precompute / layout plumbing (no (B, S, D) materialization):
    #   fold Linear(128, 1) into the table: scores[v] = emb_table[v, :] @ W.
    scores = emb_table.astype(jnp.float32) @ lin_w.astype(jnp.float32).reshape(D)
    bias = lin_b.astype(jnp.float32).reshape(1)
    ids = text.astype(jnp.int32).reshape(-1)              # 1D -> tiny SMEM footprint
    if B_pad != B:
        ids = jnp.pad(ids, (0, (B_pad - B) * S))           # pad rows gather scores[0]

    kernel = functools.partial(_tcm_kernel, seq_len=S, b_tile=b_tile, vocab_size=V)

    cost = pl.CostEstimate(
        flops=2 * B * S + 2 * B,                            # seq-sum adds + scale/bias
        transcendentals=0,
        bytes_accessed=ids.size * 4 + V * 4 + 4 + B_pad * 4,
    )

    out = pl.pallas_call(
        kernel,
        out_shape=jax.ShapeDtypeStruct((num_tiles, 1, b_tile), jnp.float32),
        grid_spec=pltpu.PrefetchScalarGridSpec(
            num_scalar_prefetch=1,                          # token ids -> SMEM
            grid=(num_tiles,),
            in_specs=[
                pl.BlockSpec(memory_space=pltpu.MemorySpace.SMEM),   # scores (V,)
                pl.BlockSpec(memory_space=pltpu.MemorySpace.SMEM),   # bias (1,)
            ],
            out_specs=pl.BlockSpec((1, 1, b_tile), lambda i, ids: (i, 0, 0)),
        ),
        compiler_params=pltpu.CompilerParams(
            dimension_semantics=("parallel",)),             # independent batch tiles
        cost_estimate=cost,
    )(ids, scores, bias)

    return out.reshape(B_pad)[:B].reshape(B, 1)


if __name__ == "__main__":
    key = jax.random.PRNGKey(0)
    k_emb, k_w, k_b, k_tok = jax.random.split(key, 4)

    vocab_size = 50
    B, S, D = 2, 8, 128

    # Deterministic synthetic parameters (shapes per the module's __init__).
    emb_table = jax.random.normal(k_emb, (vocab_size, D), dtype=jnp.float32)
    lin_w = jax.random.normal(k_w, (1, D), dtype=jnp.float32) * 0.05   # Linear(128,1).weight
    lin_b = jax.random.normal(k_b, (1,), dtype=jnp.float32) * 0.05     # Linear(128,1).bias

    text = jax.random.randint(k_tok, (B, S), 0, vocab_size, dtype=jnp.int32)

    out = text_classification_forward(text, emb_table, lin_w, lin_b)
    out = jax.block_until_ready(out)

    # Reference check in plain JAX (embedding -> mean over seq -> linear).
    ref = jnp.take(emb_table, text, axis=0).mean(axis=1) @ lin_w.T + lin_b
    assert out.shape == (B, 1)
    assert jnp.allclose(out, ref, atol=1e-4, rtol=1e-4)

    print("KERNEL_OK")
</pallas_src>

<mosaic_0001>
module attributes {stable_mosaic.version = 11 : i64} {
  func.func @_tcm_kernel(%arg0: i32, %arg1: memref<16xi32, #tpu.memory_space<smem>>, %arg2: memref<50xf32, #tpu.memory_space<smem>>, %arg3: memref<1xf32, #tpu.memory_space<smem>>, %arg4: memref<1x1x2xf32, #tpu.memory_space<vmem>>) attributes {dimension_semantics = [#tpu.dimension_semantics<parallel>], iteration_bounds = array<i64: 1>, scalar_prefetch = 1 : i64, scratch_operands = 0 : i64, tpu.core_type = #tpu.core_type<tc>, window_params = [{transform_indices = @transform_0, window_bounds = array<i64: 50>}, {transform_indices = @transform_1, window_bounds = array<i64: 1>}, {transform_indices = @transform_2, window_bounds = array<i64: 1, 1, 2>}]} {
    %c0 = arith.constant 0 : index
    %0 = memref.load %arg3[%c0] : memref<1xf32, #tpu.memory_space<smem>>
    %1 = tpu.iota {dimensions = array<i32: 2>} : vector<1x1x2xi32>
    %cst = arith.constant 0.000000e+00 : f32
    %2 = vector.broadcast %cst : f32 to vector<1x1x2xf32>
    %c2_i32 = arith.constant 2 : i32
    %3 = arith.muli %arg0, %c2_i32 : i32
    %c0_i32 = arith.constant 0 : i32
    %4 = arith.addi %3, %c0_i32 : i32
    %c8_i32 = arith.constant 8 : i32
    %5 = arith.muli %4, %c8_i32 : i32
    %cst_0 = arith.constant 0.000000e+00 : f32
    %c0_i32_1 = arith.constant 0 : i32
    %6 = arith.addi %5, %c0_i32_1 : i32
    %7 = arith.index_cast %6 : i32 to index
    %8 = memref.load %arg1[%7] : memref<16xi32, #tpu.memory_space<smem>>
    %c0_i32_2 = arith.constant 0 : i32
    %9 = arith.maxsi %8, %c0_i32_2 : i32
    %c49_i32 = arith.constant 49 : i32
    %10 = arith.minsi %9, %c49_i32 : i32
    %11 = arith.index_cast %10 : i32 to index
    %12 = memref.load %arg2[%11] : memref<50xf32, #tpu.memory_space<smem>>
    %13 = arith.addf %cst_0, %12 : f32
    %c1_i32 = arith.constant 1 : i32
    %14 = arith.addi %5, %c1_i32 : i32
    %15 = arith.index_cast %14 : i32 to index
    %16 = memref.load %arg1[%15] : memref<16xi32, #tpu.memory_space<smem>>
    %c0_i32_3 = arith.constant 0 : i32
    %17 = arith.maxsi %16, %c0_i32_3 : i32
    %c49_i32_4 = arith.constant 49 : i32
    %18 = arith.minsi %17, %c49_i32_4 : i32
    %19 = arith.index_cast %18 : i32 to index
    %20 = memref.load %arg2[%19] : memref<50xf32, #tpu.memory_space<smem>>
    %21 = arith.addf %13, %20 : f32
    %c2_i32_5 = arith.constant 2 : i32
    %22 = arith.addi %5, %c2_i32_5 : i32
    %23 = arith.index_cast %22 : i32 to index
    %24 = memref.load %arg1[%23] : memref<16xi32, #tpu.memory_space<smem>>
    %c0_i32_6 = arith.constant 0 : i32
    %25 = arith.maxsi %24, %c0_i32_6 : i32
    %c49_i32_7 = arith.constant 49 : i32
    %26 = arith.minsi %25, %c49_i32_7 : i32
    %27 = arith.index_cast %26 : i32 to index
    %28 = memref.load %arg2[%27] : memref<50xf32, #tpu.memory_space<smem>>
    %29 = arith.addf %21, %28 : f32
    %c3_i32 = arith.constant 3 : i32
    %30 = arith.addi %5, %c3_i32 : i32
    %31 = arith.index_cast %30 : i32 to index
    %32 = memref.load %arg1[%31] : memref<16xi32, #tpu.memory_space<smem>>
    %c0_i32_8 = arith.constant 0 : i32
    %33 = arith.maxsi %32, %c0_i32_8 : i32
    %c49_i32_9 = arith.constant 49 : i32
    %34 = arith.minsi %33, %c49_i32_9 : i32
    %35 = arith.index_cast %34 : i32 to index
    %36 = memref.load %arg2[%35] : memref<50xf32, #tpu.memory_space<smem>>
    %37 = arith.addf %29, %36 : f32
    %c4_i32 = arith.constant 4 : i32
    %38 = arith.addi %5, %c4_i32 : i32
    %39 = arith.index_cast %38 : i32 to index
    %40 = memref.load %arg1[%39] : memref<16xi32, #tpu.memory_space<smem>>
    %c0_i32_10 = arith.constant 0 : i32
    %41 = arith.maxsi %40, %c0_i32_10 : i32
    %c49_i32_11 = arith.constant 49 : i32
    %42 = arith.minsi %41, %c49_i32_11 : i32
    %43 = arith.index_cast %42 : i32 to index
    %44 = memref.load %arg2[%43] : memref<50xf32, #tpu.memory_space<smem>>
    %45 = arith.addf %37, %44 : f32
    %c5_i32 = arith.constant 5 : i32
    %46 = arith.addi %5, %c5_i32 : i32
    %47 = arith.index_cast %46 : i32 to index
    %48 = memref.load %arg1[%47] : memref<16xi32, #tpu.memory_space<smem>>
    %c0_i32_12 = arith.constant 0 : i32
    %49 = arith.maxsi %48, %c0_i32_12 : i32
    %c49_i32_13 = arith.constant 49 : i32
    %50 = arith.minsi %49, %c49_i32_13 : i32
    %51 = arith.index_cast %50 : i32 to index
    %52 = memref.load %arg2[%51] : memref<50xf32, #tpu.memory_space<smem>>
    %53 = arith.addf %45, %52 : f32
    %c6_i32 = arith.constant 6 : i32
    %54 = arith.addi %5, %c6_i32 : i32
    %55 = arith.index_cast %54 : i32 to index
    %56 = memref.load %arg1[%55] : memref<16xi32, #tpu.memory_space<smem>>
    %c0_i32_14 = arith.constant 0 : i32
    %57 = arith.maxsi %56, %c0_i32_14 : i32
    %c49_i32_15 = arith.constant 49 : i32
    %58 = arith.minsi %57, %c49_i32_15 : i32
    %59 = arith.index_cast %58 : i32 to index
    %60 = memref.load %arg2[%59] : memref<50xf32, #tpu.memory_space<smem>>
    %61 = arith.addf %53, %60 : f32
    %c7_i32 = arith.constant 7 : i32
    %62 = arith.addi %5, %c7_i32 : i32
    %63 = arith.index_cast %62 : i32 to index
    %64 = memref.load %arg1[%63] : memref<16xi32, #tpu.memory_space<smem>>
    %c0_i32_16 = arith.constant 0 : i32
    %65 = arith.maxsi %64, %c0_i32_16 : i32
    %c49_i32_17 = arith.constant 49 : i32
    %66 = arith.minsi %65, %c49_i32_17 : i32
    %67 = arith.index_cast %66 : i32 to index
    %68 = memref.load %arg2[%67] : memref<50xf32, #tpu.memory_space<smem>>
    %69 = arith.addf %61, %68 : f32
    %c8_i32_18 = arith.constant 8 : i32
    %cst_19 = arith.constant 1.250000e-01 : f32
    %70 = arith.mulf %69, %cst_19 : f32
    %71 = arith.addf %70, %0 : f32
    %c0_i32_20 = arith.constant 0 : i32
    %72 = vector.broadcast %c0_i32_20 : i32 to vector<1x1x2xi32>
    %73 = arith.cmpi eq, %1, %72 : vector<1x1x2xi32>
    %74 = vector.broadcast %71 : f32 to vector<1x1x2xf32>
    %75 = arith.select %73, %74, %2 : vector<1x1x2xi1>, vector<1x1x2xf32>
    %c2_i32_21 = arith.constant 2 : i32
    %76 = arith.muli %arg0, %c2_i32_21 : i32
    %c1_i32_22 = arith.constant 1 : i32
    %77 = arith.addi %76, %c1_i32_22 : i32
    %c8_i32_23 = arith.constant 8 : i32
    %78 = arith.muli %77, %c8_i32_23 : i32
    %cst_24 = arith.constant 0.000000e+00 : f32
    %c0_i32_25 = arith.constant 0 : i32
    %79 = arith.addi %78, %c0_i32_25 : i32
    %80 = arith.index_cast %79 : i32 to index
    %81 = memref.load %arg1[%80] : memref<16xi32, #tpu.memory_space<smem>>
    %c0_i32_26 = arith.constant 0 : i32
    %82 = arith.maxsi %81, %c0_i32_26 : i32
    %c49_i32_27 = arith.constant 49 : i32
    %83 = arith.minsi %82, %c49_i32_27 : i32
    %84 = arith.index_cast %83 : i32 to index
    %85 = memref.load %arg2[%84] : memref<50xf32, #tpu.memory_space<smem>>
    %86 = arith.addf %cst_24, %85 : f32
    %c1_i32_28 = arith.constant 1 : i32
    %87 = arith.addi %78, %c1_i32_28 : i32
    %88 = arith.index_cast %87 : i32 to index
    %89 = memref.load %arg1[%88] : memref<16xi32, #tpu.memory_space<smem>>
    %c0_i32_29 = arith.constant 0 : i32
    %90 = arith.maxsi %89, %c0_i32_29 : i32
    %c49_i32_30 = arith.constant 49 : i32
    %91 = arith.minsi %90, %c49_i32_30 : i32
    %92 = arith.index_cast %91 : i32 to index
    %93 = memref.load %arg2[%92] : memref<50xf32, #tpu.memory_space<smem>>
    %94 = arith.addf %86, %93 : f32
    %c2_i32_31 = arith.constant 2 : i32
    %95 = arith.addi %78, %c2_i32_31 : i32
    %96 = arith.index_cast %95 : i32 to index
    %97 = memref.load %arg1[%96] : memref<16xi32, #tpu.memory_space<smem>>
    %c0_i32_32 = arith.constant 0 : i32
    %98 = arith.maxsi %97, %c0_i32_32 : i32
    %c49_i32_33 = arith.constant 49 : i32
    %99 = arith.minsi %98, %c49_i32_33 : i32
    %100 = arith.index_cast %99 : i32 to index
    %101 = memref.load %arg2[%100] : memref<50xf32, #tpu.memory_space<smem>>
    %102 = arith.addf %94, %101 : f32
    %c3_i32_34 = arith.constant 3 : i32
    %103 = arith.addi %78, %c3_i32_34 : i32
    %104 = arith.index_cast %103 : i32 to index
    %105 = memref.load %arg1[%104] : memref<16xi32, #tpu.memory_space<smem>>
    %c0_i32_35 = arith.constant 0 : i32
    %106 = arith.maxsi %105, %c0_i32_35 : i32
    %c49_i32_36 = arith.constant 49 : i32
    %107 = arith.minsi %106, %c49_i32_36 : i32
    %108 = arith.index_cast %107 : i32 to index
    %109 = memref.load %arg2[%108] : memref<50xf32, #tpu.memory_space<smem>>
    %110 = arith.addf %102, %109 : f32
    %c4_i32_37 = arith.constant 4 : i32
    %111 = arith.addi %78, %c4_i32_37 : i32
    %112 = arith.index_cast %111 : i32 to index
    %113 = memref.load %arg1[%112] : memref<16xi32, #tpu.memory_space<smem>>
    %c0_i32_38 = arith.constant 0 : i32
    %114 = arith.maxsi %113, %c0_i32_38 : i32
    %c49_i32_39 = arith.constant 49 : i32
    %115 = arith.minsi %114, %c49_i32_39 : i32
    %116 = arith.index_cast %115 : i32 to index
    %117 = memref.load %arg2[%116] : memref<50xf32, #tpu.memory_space<smem>>
    %118 = arith.addf %110, %117 : f32
    %c5_i32_40 = arith.constant 5 : i32
    %119 = arith.addi %78, %c5_i32_40 : i32
    %120 = arith.index_cast %119 : i32 to index
    %121 = memref.load %arg1[%120] : memref<16xi32, #tpu.memory_space<smem>>
    %c0_i32_41 = arith.constant 0 : i32
    %122 = arith.maxsi %121, %c0_i32_41 : i32
    %c49_i32_42 = arith.constant 49 : i32
    %123 = arith.minsi %122, %c49_i32_42 : i32
    %124 = arith.index_cast %123 : i32 to index
    %125 = memref.load %arg2[%124] : memref<50xf32, #tpu.memory_space<smem>>
    %126 = arith.addf %118, %125 : f32
    %c6_i32_43 = arith.constant 6 : i32
    %127 = arith.addi %78, %c6_i32_43 : i32
    %128 = arith.index_cast %127 : i32 to index
    %129 = memref.load %arg1[%128] : memref<16xi32, #tpu.memory_space<smem>>
    %c0_i32_44 = arith.constant 0 : i32
    %130 = arith.maxsi %129, %c0_i32_44 : i32
    %c49_i32_45 = arith.constant 49 : i32
    %131 = arith.minsi %130, %c49_i32_45 : i32
    %132 = arith.index_cast %131 : i32 to index
    %133 = memref.load %arg2[%132] : memref<50xf32, #tpu.memory_space<smem>>
    %134 = arith.addf %126, %133 : f32
    %c7_i32_46 = arith.constant 7 : i32
    %135 = arith.addi %78, %c7_i32_46 : i32
    %136 = arith.index_cast %135 : i32 to index
    %137 = memref.load %arg1[%136] : memref<16xi32, #tpu.memory_space<smem>>
    %c0_i32_47 = arith.constant 0 : i32
    %138 = arith.maxsi %137, %c0_i32_47 : i32
    %c49_i32_48 = arith.constant 49 : i32
    %139 = arith.minsi %138, %c49_i32_48 : i32
    %140 = arith.index_cast %139 : i32 to index
    %141 = memref.load %arg2[%140] : memref<50xf32, #tpu.memory_space<smem>>
    %142 = arith.addf %134, %141 : f32
    %c8_i32_49 = arith.constant 8 : i32
    %cst_50 = arith.constant 1.250000e-01 : f32
    %143 = arith.mulf %142, %cst_50 : f32
    %144 = arith.addf %143, %0 : f32
    %c1_i32_51 = arith.constant 1 : i32
    %145 = vector.broadcast %c1_i32_51 : i32 to vector<1x1x2xi32>
    %146 = arith.cmpi eq, %1, %145 : vector<1x1x2xi32>
    %147 = vector.broadcast %144 : f32 to vector<1x1x2xf32>
    %148 = arith.select %146, %147, %75 : vector<1x1x2xi1>, vector<1x1x2xf32>
    %c0_52 = arith.constant 0 : index
    %c0_53 = arith.constant 0 : index
    %c0_54 = arith.constant 0 : index
    %149 = vector.load %arg4[%c0_52, %c0_53, %c0_54] : memref<1x1x2xf32, #tpu.memory_space<vmem>>, vector<1x1x2xf32>
    tpu.vector_store %arg4[%c0_52, %c0_53, %c0_54], %148 {strides = array<i32>} : memref<1x1x2xf32, #tpu.memory_space<vmem>>, vector<1x1x2xf32>,
    return
  }
  func.func @transform_0(%arg0: i32, %arg1: memref<16xi32, #tpu.memory_space<smem>>) -> i32 {
    %c0_i32 = arith.constant 0 : i32
    %c0_i32_0 = arith.constant 0 : i32
    return %c0_i32 : i32
  }
  func.func @transform_1(%arg0: i32, %arg1: memref<16xi32, #tpu.memory_space<smem>>) -> i32 {
    %c0_i32 = arith.constant 0 : i32
    %c0_i32_0 = arith.constant 0 : i32
    return %c0_i32 : i32
  }
  func.func @transform_2(%arg0: i32, %arg1: memref<16xi32, #tpu.memory_space<smem>>) -> (i32, i32, i32) {
    %c0_i32 = arith.constant 0 : i32
    %c0_i32_0 = arith.constant 0 : i32
    %c0_i32_1 = arith.constant 0 : i32
    return %arg0, %c0_i32, %c0_i32_0 : i32, i32, i32
  }
}

</mosaic_0001>

<bundles_post_ra>
// kernel: tpu_custom_call.1
= control target key start
LH: loop header
LB: loop body
LE: loop exit
PB: predicated region body
PF: predicated region fallthrough
CT: control target
= control target key end

     0   :  { %s458_s0 = inlined_call_operand.vmem [shape: s32[16], index: 0, kind: input, shape index: {}]   ;;  %s459_s1 = inlined_call_operand.vmem [shape: f32[50], index: 1, kind: input, shape index: {}]   ;;  %s460_s2 = inlined_call_operand.<no memory space> [shape: f32[1], index: 2, kind: input, shape index: {}]   ;;  %s461_s3 = inlined_call_operand.hbm [shape: f32[1,1,2], index: 3, kind: output, shape index: {}]  }
   0x1   :  { %s8_s14 = sshll.u32 %s458_s0, 4  ;;  %s9_s14 = int_to_ptr.vmem [resolvable:$true] %s8_s14 }
   0x2   :  { %s323_s15 = scalar_lea.vmem %s9_s14, 16  ;;  %p328_p1 = scmp.lt.s32.totalorder %s9_s14, %s9_s14 }
   0x3   :  { %p324_p0 = scmp.ne.s32.totalorder %s9_s14, %s323_s15  ;;  %p329_p2 = scmp.lt.s32.totalorder %s323_s15, %s323_s15 }
   0x5   :  { %p330_p3 = por %p329_p2, %p328_p1 }
   0x7   :  { %p331_p4 = pnand %p330_p3, %p324_p0 }
   0x9   :  { %334 = shalt.err (!%p331_p4)  }
   0xa   :  { %s375_s16 = smov [#allocation3]  }
   0xb   :  { %11 = dma.vmem_to_smem %s9_s14, 16, %s375_s16, [#allocation2] }
   0xc   :  { %369 = dma.done.wait [#allocation2], 16 }
   0xd   :  { %370 = vsyncadd [#allocation2], 4294967280 }
   0xe   :  { %14 = sfence }
   0xf   :  { %15 = vsyncpa [#allocation7], 0 }
  0x10   :  { %16 = vsyncpa [#allocation6], 0  ;;  %s23_s19 = sshll.u32 %s459_s1, 4  ;;  %s24_s19 = int_to_ptr.vmem [resolvable:$true] %s23_s19 }
  0x11   :  { %s335_s0 = scalar_lea.vmem %s24_s19, 16  ;;  %p340_p6 = scmp.lt.s32.totalorder %s24_s19, %s24_s19 }
  0x12   :  { %p336_p5 = scmp.ne.s32.totalorder %s24_s19, %s335_s0  ;;  %p341_p7 = scmp.lt.s32.totalorder %s335_s0, %s335_s0 }
  0x14   :  { %p342_p8 = por %p341_p7, %p340_p6 }
  0x16   :  { %p343_p9 = pnand %p342_p8, %p336_p5 }
  0x18   :  { %346 = shalt.err (!%p343_p9)
}
  0x19   :  { %s376_s20 = smov [#allocation5]  }
  0x1a   :  { %26 = dma.vmem_to_smem %s24_s19, 16, %s376_s20, [#allocation7]  }
  0x1b   :  { %371 = dma.done.wait [#allocation7], 16  }
  0x1c   :  { %372 = vsyncadd [#allocation7], 4294967280 }
  0x1d   :  { %32 = sfence }
  0x1e   :  { %s37_s21 = sld [smem:[#allocation3]]  ;;  %s198_s22 = sld [smem:[#allocation3 + $0x1]]  ;;  %v34_v0 = vlaneseq  ;;  %vm176_vm2 = vcmask 8192  }
  0x1f   :  { %s204_s23 = sld [smem:[#allocation3 + $0x2]]  ;;  %s210_s24 = sld [smem:[#allocation3 + $0x3]] }
  0x20   :  { %s404_s25 = sld [smem:[#allocation3 + $0x4]]  ;;  %s406_s1 = sld [smem:[#allocation3 + $0x5]]  ;;  %v35_v1 = vand.u32 127, %v34_v0 }
  0x21   :  { %s408_s26 = sld [smem:[#allocation3 + $0x6]]  ;;  %s410_s27 = sld [smem:[#allocation3 + $0x7]] }
  0x22   :  { %s412_s28 = sld [smem:[#allocation3 + $0x8]]  ;;  %s414_s29 = sld [smem:[#allocation3 + $0x9]]  ;;  %vm102_vm0 = vcmp.eq.s32.totalorder %v35_v1, 0  ;;  %vm173_vm1 = vcmp.eq.s32.totalorder %v35_v1, 1 }
  0x23   :  { %s252_s13 = sld [smem:[#allocation3 + $0xa]]  ;;  %s258_s16 = sld [smem:[#allocation3 + $0xb]] }
  0x24   :  { %p38_p10 = scmp.gt.s32.totalorder %s37_s21, 0  ;;  %p193_p11 = scmp.lt.s32.totalorder %s37_s21, 49 }
  0x25   :  { %p46_p12 = scmp.gt.s32.totalorder %s198_s22, 0  ;;  %p199_p13 = scmp.lt.s32.totalorder %s198_s22, 49 }
  0x26   :  { %s463_s21 = smov (!%p38_p10, %s37_s21), 0  ;;  %p54_p0 = scmp.gt.s32.totalorder %s204_s23, 0 }
  0x27   :  { %s465_s22 = smov (!%p46_p12, %s198_s22), 0  ;;  %s467_s21 = smov (!%p193_p11, %s463_s21), 49 }
  0x28   :  { %s469_s22 = smov (!%p199_p13, %s465_s22), 49  ;;  %s42_s30 = sld [smem:[#allocation5 + %s467_s21]] }
  0x29   :  { %s50_s4 = sld [smem:[#allocation5 + %s469_s22]]  ;;  %p205_p1 = scmp.lt.s32.totalorder %s204_s23, 49 }
  0x2a   :  { %s471_s23 = smov (!%p54_p0, %s204_s23), 0  ;;  %p62_p2 = scmp.gt.s32.totalorder %s210_s24, 0 }
  0x2b   :  { %p211_p3 = scmp.lt.s32.totalorder %s210_s24, 49  ;;  %s473_s23 = smov (!%p205_p1, %s471_s23), 49 }
  0x2c   :  { %s475_s24 = smov (!%p62_p2, %s210_s24), 0  ;;  %s58_s5 = sld [smem:[#allocation5 + %s473_s23]] }
  0x2d   :  { %p70_p4 = scmp.gt.s32.totalorder %s404_s25, 0  ;;  %p217_p5 = scmp.lt.s32.totalorder %s404_s25, 49 }
  0x2e   :  { %s477_s24 = smov (!%p211_p3, %s475_s24), 49  ;;  %p78_p6 = scmp.gt.s32.totalorder %s406_s1, 0 }
  0x2f   :  { %s51_s6 = sadd.f32 %s50_s4, %s42_s30  ;;  %s479_s25 = smov (!%p70_p4, %s404_s25), 0 }
  0x30   :  { %s66_s7 = sld [smem:[#allocation5 + %s477_s24]]  ;;  %s481_s25 = smov (!%p217_p5, %s479_s25), 49 }
  0x31   :  { %p223_p7 = scmp.lt.s32.totalorder %s406_s1, 49  ;;  %s74_s9 = sld [smem:[#allocation5 + %s481_s25]] }
  0x32   :  { %s59_s8 = sadd.f32 %s58_s5, %s51_s6  ;;  %p86_p8 = scmp.gt.s32.totalorder %s408_s26, 0 }
  0x33   :  { %s483_s1 = smov (!%p78_p6, %s406_s1), 0  ;;  %p229_p9 = scmp.lt.s32.totalorder %s408_s26, 49 }
  0x34   :  { %s87_s10 = scalar_select %p86_p8, %s408_s26, 0 }
  0x35   :  { %s485_s1 = smov (!%p223_p7, %s483_s1), 49  ;;  %p94_p10 = scmp.gt.s32.totalorder %s410_s27, 0 }
  0x36   :  { %s67_s11 = sadd.f32 %s66_s7, %s59_s8  ;;  %s487_s10 = smov (!%p229_p9, %s87_s10), 49 }
  0x37   :  { %s82_s12 = sld [smem:[#allocation5 + %s485_s1]]  ;;  %p235_p11 = scmp.lt.s32.totalorder %s410_s27, 49 }
  0x38   :  { %s75_s14 = sadd.f32 %s74_s9, %s67_s11  ;;  %p109_p12 = scmp.gt.s32.totalorder %s412_s28, 0 }
  0x39   :  { %s489_s27 = smov (!%p94_p10, %s410_s27), 0  ;;  %p241_p13 = scmp.lt.s32.totalorder %s412_s28, 49 }
  0x3a   :  { %s110_s15 = scalar_select %p109_p12, %s412_s28, 0 }
  0x3b   :  { %s491_s27 = smov (!%p235_p11, %s489_s27), 49  ;;  %s90_s17 = sld [smem:[#allocation5 + %s487_s10]] }
  0x3c   :  { %p117_p0 = scmp.gt.s32.totalorder %s414_s29, 0  ;;  %p247_p1 = scmp.lt.s32.totalorder %s414_s29, 49 }
  0x3d   :  { %s83_s18 = sadd.f32 %s82_s12, %s75_s14  ;;  %s493_s15 = smov (!%p241_p13, %s110_s15), 49 }
  0x3e   :  { %s495_s29 = smov (!%p117_p0, %s414_s29), 0  ;;  %s113_s19 = sld [smem:[#allocation5 + %s493_s15]] }
  0x3f   :  { %p125_p2 = scmp.gt.s32.totalorder %s252_s13, 0  ;;  %s497_s29 = smov (!%p247_p1, %s495_s29), 49 }
  0x40   :  { %s434_s0 = sld [smem:[#allocation5 + %s491_s27]]  ;;  %p253_p3 = scmp.lt.s32.totalorder %s252_s13, 49 }
  0x41   :  { %s121_s20 = sld [smem:[#allocation5 + %s497_s29]]  ;;  %s436_s21 = sadd.f32 %s90_s17, %s83_s18 }
  0x42   :  { %p133_p4 = scmp.gt.s32.totalorder %s258_s16, 0  ;;  %s499_s13 = smov (!%p125_p2, %s252_s13), 0 }
  0x43   :  { %p259_p5 = scmp.lt.s32.totalorder %s258_s16, 49  ;;  %s264_s22 = sld [smem:[#allocation3 + $0xc]] }
  0x44   :  { %s501_s13 = smov (!%p253_p3, %s499_s13), 49  ;;  %s503_s16 = smov (!%p133_p4, %s258_s16), 0 }
  0x45   :  { %s129_s24 = sld [smem:[#allocation5 + %s501_s13]]  ;;  %s505_s16 = smov (!%p259_p5, %s503_s16), 49 }
  0x46   :  { %s270_s25 = sld [smem:[#allocation3 + $0xd]]  ;;  %s276_s1 = sld [smem:[#allocation3 + $0xe]] }
  0x47   :  { %s122_s23 = sadd.f32 %s121_s20, %s113_s19  ;;  %s137_s26 = sld [smem:[#allocation5 + %s505_s16]] }
  0x48   :  { %s99_s27 = sadd.f32 %s434_s0, %s436_s21  ;;  %s282_s29 = sld [smem:[#allocation3 + $0xf]] }
  0x49   :  { %p141_p6 = scmp.gt.s32.totalorder %s264_s22, 0  ;;  %p265_p7 = scmp.lt.s32.totalorder %s264_s22, 49 }
  0x4a   :  { %s100_s7 = smul.f32 0.125, %s99_s27  ;;  %s377_s17 = smov [#allocation8]  }
  0x4b   :  { %s507_s22 = smov (!%p141_p6, %s264_s22), 0  ;;  %s130_s28 = sadd.f32 %s129_s24, %s122_s23 }
  0x4c   :  { %s509_s22 = smov (!%p265_p7, %s507_s22), 49  ;;  %p149_p8 = scmp.gt.s32.totalorder %s270_s25, 0 }
  0x4d   :  { %p271_p9 = scmp.lt.s32.totalorder %s270_s25, 49  ;;  %s138_s30 = sadd.f32 %s137_s26, %s130_s28 }
  0x4e   :  { %s145_s4 = sld [smem:[#allocation5 + %s509_s22]]  ;;  %s511_s25 = smov (!%p149_p8, %s270_s25), 0 }
  0x4f   :  { %p157_p10 = scmp.gt.s32.totalorder %s276_s1, 0  ;;  %p277_p11 = scmp.lt.s32.totalorder %s276_s1, 49 }
  0x50   :  { %s513_s25 = smov (!%p271_p9, %s511_s25), 49  ;;  %p165_p12 = scmp.gt.s32.totalorder %s282_s29, 0 }
  0x51   :  { %s515_s1 = smov (!%p157_p10, %s276_s1), 0  ;;  %s153_s5 = sld [smem:[#allocation5 + %s513_s25]] }
  0x52   :  { %p283_p13 = scmp.lt.s32.totalorder %s282_s29, 49  ;;  %s517_s1 = smov (!%p277_p11, %s515_s1), 49 }
  0x53   :  { %s519_s29 = smov (!%p165_p12, %s282_s29), 0  ;;  %s161_s8 = sld [smem:[#allocation5 + %s517_s1]] }
  0x54   :  { %s146_s6 = sadd.f32 %s145_s4, %s138_s30  ;;  %s521_s29 = smov (!%p283_p13, %s519_s29), 49 }
  0x55   :  { %s169_s10 = sld [smem:[#allocation5 + %s521_s29]]  ;;  %s101_s13 = sadd.f32 %s100_s7, %s460_s2 }
  0x56   :  { %s184_s18 = sshll.u32 %s377_s17, 4  ;;  %s185_s18 = int_to_ptr.vmem [resolvable:$true] %s184_s18 }
  0x57   :  { %s154_s9 = sadd.f32 %s153_s5, %s146_s6  ;;  %v103_v2 = vstv %s101_s13  ;;  %s347_s21 = scalar_lea.vmem %s185_s18, 16 }
  0x58   :  { %v104_v3 = vsel %vm102_vm0, %v103_v2, 0.0  ;;  %p348_p0 = scmp.ne.s32.totalorder %s185_s18, %s347_s21  ;;  %s351_s22 = scalar_lea.vmem %s185_s18, 32 }
  0x59   :  { %s162_s14 = sadd.f32 %s161_s8, %s154_s9  ;;  %p352_p1 = scmp.lt.s32.totalorder %s185_s18, %s185_s18 }
  0x5a   :  { %p353_p2 = scmp.lt.s32.totalorder %s351_s22, %s347_s21 }
  0x5b   :  { %s170_s15 = sadd.f32 %s169_s10, %s162_s14 }
  0x5c   :  { %p354_p3 = por %p353_p2, %p352_p1 }
  0x5d   :  { %s171_s16 = smul.f32 0.125, %s170_s15 }
  0x5e   :  { %p355_p4 = pnand %p354_p3, %p348_p0 }
  0x5f   :  { %s172_s20 = sadd.f32 %s171_s16, %s460_s2 }
  0x61   :  { %v174_v4 = vstv %s172_s20 }
  0x62   :  { %v175_v5 = vsel %vm173_vm1, %v174_v4, %v104_v3 }
  0x63   :  { %177 = vst.msk [vmem:[#allocation8] sm:$0x1] %vm176_vm2, %v175_v5 }
  0x64   :  { %358 = shalt.err (!%p355_p4)
}
  0x65   :  { %s359_s25 = scalar_lea.hbm %s461_s3, 16 }
  0x66   :  { %p360_p5 = scmp.ne.s32.totalorder %s461_s3, %s359_s25  ;;  %p363_p6 = scmp.lt.u32.totalorder %s359_s25, %s461_s3 }
  0x68   :  { %p365_p7 = pnand %p363_p6, %p360_p5 }
  0x6a   :  { %368 = shalt.err (!%p365_p7)
}
  0x6b   :  { %187 = dma.vmem_to_hbm [thread:$0]  %s185_s18, 16, %s461_s3, [#allocation6]  }
  0x6c   :  { %373 = dma.done.wait [#allocation6], 16  }
  0x6d   :  { %374 = vsyncadd [#allocation6], 4294967280 }
  0x6e   :  { %191 = vsyncpa [#allocation6], 1 }
  0x6f   :  { %192 = vsyncpa [#allocation7], 1 }

</bundles_post_ra>
